<compile_context>
chip_gen: v5e
topology: v5e:2x2
jax: 0.10.0
libtpu: 0.0.40
codegen_flags: <defaults>
</compile_context>

<pallas_src>
import math

import jax
import jax.numpy as jnp
from jax.experimental import pallas as pl
from jax.experimental.pallas import tpu as pltpu

# ---- module hyper-parameters (hard-coded in the PyTorch source) -------------
d_model = 512
seq_len = 200


# ------------------------------ Pallas kernel --------------------------------
def _posenc_kernel(x_ref, pe_ref, o_ref):
    # x_ref : (1, L, TD)  current batch element, current D-tile
    # pe_ref: (L, TD)     positional-encoding tile (VMEM-resident across batch steps)
    # o_ref : (1, L, TD)  aliased onto x's HBM buffer
    scale = jnp.float32(math.sqrt(d_model))
    o_ref[0] = (x_ref[0] * scale + pe_ref[...]).astype(o_ref.dtype)


def positional_encoder(x, pe, *, d_tile=None):
    """x: (B, L, d_model) f32, pe: (L, d_model) f32 -> (B, L, d_model) f32."""
    B, L, D = x.shape
    assert pe.shape == (L, D)
    if d_tile is None:
        # Small batches leave each TensorCore a single step if we only tile over
        # batch; split D so per-core DMA-in/out of consecutive steps overlap.
        # For larger batches, full-D blocks per batch element pipeline fine and
        # avoid the ~0.35 us per extra grid step.
        d_tile = 256 if (B <= 4 and D % 256 == 0) else D
    nd = D // d_tile

    return pl.pallas_call(
        _posenc_kernel,
        out_shape=jax.ShapeDtypeStruct((B, L, D), x.dtype),
        grid_spec=pltpu.PrefetchScalarGridSpec(
            num_scalar_prefetch=0,
            # D-tile axis OUTER, batch INNER: PE block index is constant across
            # consecutive (batch) steps -> tile stays resident, no re-DMA.
            grid=(nd, B),
            in_specs=[
                pl.BlockSpec((1, L, d_tile), lambda j, b: (b, 0, j)),
                pl.BlockSpec((L, d_tile), lambda j, b: (0, j)),
            ],
            out_specs=pl.BlockSpec((1, L, d_tile), lambda j, b: (b, 0, j)),
        ),
        compiler_params=pltpu.CompilerParams(
            # Every block is written exactly once and independently.
            dimension_semantics=("parallel", "parallel"),
        ),
        # x (operand 0) is dead after this op in the module: write the output
        # into x's HBM buffer instead of allocating a second (B, L, D) array.
        input_output_aliases={0: 0},
    )(x, pe)


# ----------------- PE table (matches the PyTorch __init__ loop) ---------------
def make_pe_matrix(L=seq_len, D=d_model, dtype=jnp.float32):
    # PyTorch reference uses the RAW index i in the exponent for both parities:
    #   even i: sin(pos / 10000 ** (2*i/d_model))
    #   odd  i: cos(pos / 10000 ** (2*i/d_model))
    pos = jnp.arange(L, dtype=jnp.float32)[:, None]          # (L, 1)
    i = jnp.arange(D, dtype=jnp.float32)[None, :]            # (1, D)
    angle = pos / jnp.power(jnp.float32(10000.0), 2.0 * i / jnp.float32(D))
    even = (jnp.arange(D)[None, :] % 2) == 0
    pe = jnp.where(even, jnp.sin(angle), jnp.cos(angle))
    return pe.astype(dtype)


# ------------------------------------ main ------------------------------------
if __name__ == "__main__":
    # The module registers a (1, seq_len, d_model) buffer, so forward implies
    # L == seq_len, D == d_model. Small batch.
    B, L, D = 2, seq_len, d_model

    key = jax.random.PRNGKey(0)
    x = jax.random.normal(key, (B, L, D), jnp.float32)
    pe = make_pe_matrix(L, D)

    # Pure-JAX reference, computed BEFORE the kernel since the kernel output
    # aliases x's buffer.
    ref = x * jnp.float32(math.sqrt(d_model)) + pe[None, :, :]

    out = positional_encoder(x, pe)
    jax.block_until_ready(out)

    assert out.shape == (B, L, D)
    assert out.dtype == jnp.float32
    assert jnp.allclose(out, ref, atol=1e-5, rtol=1e-5)

    print("KERNEL_OK")
</pallas_src>

<mosaic_0001>
module attributes {stable_mosaic.version = 11 : i64} {
  func.func @_posenc_kernel(%arg0: i32, %arg1: i32, %arg2: memref<1x200x256xf32, #tpu.memory_space<vmem>>, %arg3: memref<200x256xf32, #tpu.memory_space<vmem>>, %arg4: memref<1x200x256xf32, #tpu.memory_space<vmem>>) attributes {dimension_semantics = [#tpu.dimension_semantics<parallel>, #tpu.dimension_semantics<parallel>], iteration_bounds = array<i64: 2, 2>, scalar_prefetch = 0 : i64, scratch_operands = 0 : i64, tpu.core_type = #tpu.core_type<tc>, window_params = [{transform_indices = @transform_0, window_bounds = array<i64: 1, 200, 256>}, {transform_indices = @transform_1, window_bounds = array<i64: 200, 256>}, {transform_indices = @transform_2, window_bounds = array<i64: 1, 200, 256>}]} {
    %c0 = arith.constant 0 : index
    %c0_0 = arith.constant 0 : index
    %c0_1 = arith.constant 0 : index
    %0 = vector.load %arg2[%c0, %c0_0, %c0_1] : memref<1x200x256xf32, #tpu.memory_space<vmem>>, vector<1x200x256xf32>
    %1 = vector.shape_cast %0 : vector<1x200x256xf32> to vector<200x256xf32>
    %cst = arith.constant 22.6274166 : f32
    %2 = vector.broadcast %cst : f32 to vector<200x256xf32>
    %3 = arith.mulf %1, %2 : vector<200x256xf32>
    %c0_2 = arith.constant 0 : index
    %c0_3 = arith.constant 0 : index
    %4 = vector.load %arg3[%c0_2, %c0_3] : memref<200x256xf32, #tpu.memory_space<vmem>>, vector<200x256xf32>
    %5 = arith.addf %3, %4 : vector<200x256xf32>
    %c0_4 = arith.constant 0 : index
    %c0_5 = arith.constant 0 : index
    %c0_6 = arith.constant 0 : index
    %6 = vector.load %arg4[%c0_4, %c0_5, %c0_6] : memref<1x200x256xf32, #tpu.memory_space<vmem>>, vector<1x200x256xf32>
    %7 = vector.shape_cast %6 : vector<1x200x256xf32> to vector<200x256xf32>
    %8 = vector.shape_cast %5 : vector<200x256xf32> to vector<1x200x256xf32>
    tpu.vector_store %arg4[%c0_4, %c0_5, %c0_6], %8 {strides = array<i32>} : memref<1x200x256xf32, #tpu.memory_space<vmem>>, vector<1x200x256xf32>,
    return
  }
  func.func @transform_0(%arg0: i32, %arg1: i32) -> (i32, i32, i32) {
    %c0_i32 = arith.constant 0 : i32
    %c0_i32_0 = arith.constant 0 : i32
    return %arg1, %c0_i32, %arg0 : i32, i32, i32
  }
  func.func @transform_1(%arg0: i32, %arg1: i32) -> (i32, i32) {
    %c0_i32 = arith.constant 0 : i32
    %c0_i32_0 = arith.constant 0 : i32
    return %c0_i32, %arg0 : i32, i32
  }
  func.func @transform_2(%arg0: i32, %arg1: i32) -> (i32, i32, i32) {
    %c0_i32 = arith.constant 0 : i32
    %c0_i32_0 = arith.constant 0 : i32
    return %arg1, %c0_i32, %arg0 : i32, i32, i32
  }
}

</mosaic_0001>

<bundles_post_ra>
// kernel: tpu_custom_call.1
= control target key start
LH: loop header
LB: loop body
LE: loop exit
PB: predicated region body
PF: predicated region fallthrough
CT: control target
= control target key end

     0   :  { %7 = vsyncpa [#allocation3], 0  ;;  %s1439_s0 = inlined_call_operand.hbm [shape: f32[2,200,512], index: 0, kind: input, shape index: {}, may-alias: {0,2}]   ;;  %s1440_s1 = inlined_call_operand.vmem [shape: f32[200,512], index: 1, kind: input, shape index: {}]   ;;  %s1441_s2 = inlined_call_operand.hbm [shape: f32[2,200,512], index: 2, kind: output, shape index: {}, may-alias: {0,2}]  }
   0x1   :  { %9 = vsyncpa [#allocation3 + $0x1], 0 }
   0x2   :  { %10 = vsyncpa [#allocation4], 0 }
   0x3   :  { %12 = vsyncpa [#allocation4 + $0x1], 0  ;;  %s979_s9 = smov 0   ;;  %s981_s10 = smov 0  }
   0x4   :  { %s983_s11 = smov 0   ;;  %s985_s12 = smov 0  }
   0x5   :  { %s987_s13 = smov 0   ;;  %s989_s14 = smov 0  }
   0x6   :  { %s991_s15 = smov 0   ;;  %s993_s16 = smov 0  }
   0x7   :  { %s995_s17 = smov 0   ;;  %s997_s18 = smov 0  }
   0x8 LB: > { %1448 = sst [smem:[#allocation9_spill]] %s928_s11  ;;  %s699_s19 = sadd.s32 4294967295, %s956_s18   ;;  %s956_s18 = sphi %s997_s18, %s18_s18   ;;  %s952_s17 = sphi %s995_s17, %s1475_s17   ;;  %s948_s16 = sphi %s993_s16, %s1474_s16   ;;  %s944_s15 = sphi %s991_s15, %s1473_s15   ;;  %s940_s14 = sphi %s989_s14, %s1472_s14   ;;  %s936_s13 = sphi %s987_s13, %s1471_s13   ;;  %s932_s12 = sphi %s985_s12, %s1470_s12   ;;  %s928_s11 = sphi %s983_s11, %s1469_s11   ;;  %s924_s10 = sphi %s981_s10, %s1468_s10   ;;  %s920_s9 = sphi %s979_s9, %s1467_s9  }
   0x9   : > { %s700_s20 = sadd.s32 4294967294, %s956_s18   ;;  %s27_s21 = sadd.s32 1, %s948_s16 }
   0xa   : > { %s30_s22 = sadd.s32 1, %s952_s17  ;;  %p28_p0 = scmp.ge.s32.totalorder %s27_s21, 2 }
   0xb   : > { %s39_s23 = sadd.s32 1, %s936_s13  ;;  %p46_p1 = scmp.ne.s32.totalorder %s936_s13, %s932_s12 }
   0xc   : > { %p47_p2 = scmp.eq.s32.totalorder %s956_s18, 0  ;;  %s1477_s21 = smov (%p28_p0, %s27_s21), 0 }
   0xd   : > { %1449 = sst [smem:[#allocation10_spill]] %s1477_s21  ;;  %s1479_s22 = smov (!%p28_p0, %s30_s22), %s952_s17 }
   0xe   : > { %s34_s24 = ssub.s32 %s948_s16, %s1477_s21  ;;  %p1047_p3 = por %p47_p2, %p46_p1 }
   0xf   : > { %p32_p4 = scmp.ge.s32.totalorder %s1479_s22, 2  ;;  %p52_p5 = scmp.ne.s32.totalorder %s932_s12, %s928_s11 }
  0x10   : > { %p53_p6 = scmp.eq.s32.totalorder %s699_s19, 0  ;;  %s65_s26 = sadd.s32 1, %s924_s10 }
  0x11   : > { %s1481_s22 = smov (%p32_p4, %s1479_s22), 0  ;;  %p72_p8 = scmp.ne.s32.totalorder %s924_s10, %s920_s9 }
  0x12   : > { %1451 = sst [smem:[#allocation11_spill]] %s1481_s22  ;;  %p1059_p7 = por %p53_p6, %p52_p5 }
  0x13   : > { %s35_s28 = ssub.s32 %s952_s17, %s1481_s22  ;;  %p104_p9 = scmp.eq.s32.totalorder %s699_s19, 3 }
  0x14   : > { %s36_s29 = sor.u32 %s35_s28, %s34_s24  ;;  %p63_p10 = scmp.eq.s32.totalorder %s35_s28, 0 }
  0x15   : > { %p37_p11 = scmp.eq.s32.totalorder %s36_s29, 0  ;;  %p1069_p12 = por %p72_p8, %p47_p2 }
  0x16   : > { %s1074_s3 = scalar_select %p63_p10, %s924_s10, %s65_s26  }
  0x17   : > { %s1077_s4 = scalar_select %p37_p11, %s936_s13, %s39_s23  }
  0x18   : > { %1454 = sst [smem:[#allocation12_spill]] %s1074_s3  ;;  %p1082_p13 = por %p104_p9, %p46_p1 }
  0x19   : > { %1455 = sst [smem:[#allocation13_spill]] %s1077_s4  ;;  %p110_p0 = scmp.eq.s32.totalorder %s700_s20, 3 }
  0x1a   : > { %s1456_s5 = scalar_select %p1082_p13, 1, 0 }
  0x1b   : > { %p1089_p4 = por %p110_p0, %p52_p5  ;;  %p702_p2 = scmp.ge.s32.totalorder %s956_s18, 4 }
  0x1c   : > { %1457 = sst [smem:[#allocation14_spill]] %s1456_s5  ;;  %s130_s7 = sand.u32 (!%p702_p2), 1, %s936_s13  }
  0x1d   : > { %s1458_s6 = scalar_select %p1089_p4, 1, 0 }
  0x1e   : > { %126 = sbr.rel (%p702_p2) target bundleno = 93 (0x5d), region = 16  ;;  %s703_s8 = sshll.u32 (!%p702_p2), %s952_s17, 1 }
  0x1f   : > { %1459 = sst [smem:[#allocation15_spill]] %s1458_s6  ;;  %s713_s19 = smul.u32 (!%p702_p2), 400, %s130_s7 }
  0x20   : > { %s714_s23 = smul.u32 (!%p702_p2), 100, %s948_s16  ;;  %s131_s3 = scalar_lea.sflag (!%p702_p2), [#allocation3], %s130_s7 }
  0x21   : > { %s134_s26 = scalar_lea.vmem (!%p702_p2), [#allocation2], %s713_s19  ;;  %s958_s6 = smov (!%p702_p2), 512  }
  0x22   : > { %s139_s24 = sadd.s32 (!%p702_p2), %s714_s23, %s703_s8  ;;  %s144_s28 = sshll.u32 (!%p702_p2), %s134_s26, 4  ;;  %s145_s28 = int_to_ptr.vmem [resolvable:$true] %s144_s28 }
  0x23   : > { %s704_s20 = sshll.u32 %s139_s24, 3  ;;  %s959_s11 = smov 256  }
  0x24   : > { %s141_s21 = scalar_lea.hbm %s1439_s0, %s704_s20  ;;  %s960_s5 = smov 16  }
  0x25   : > { %s142_s4 = sshll.u32 %s141_s21, 4  ;;  %153 = sbr.rel (!%p1069_p12) target bundleno = 93 (0x5d), region = 24  ;;  %s143_s4 = int_to_ptr.hbm [resolvable:$true] %s142_s4 }
  0x26   : > { %719 = dma.hbm_to_vmem [thread:$0]  (%p1047_p3), %s143_s4, 6400, %s145_s28, %s131_s3, %s958_s6, %s959_s11, %s960_s5  }
  0x27   : > { %s155_s8 = sand.u32 (%p1069_p12), 1, %s924_s10   ;;  %s712_s19 = sshll.u32 (%p1069_p12), %s952_s17, 4 }
  0x28   : > { %s715_s23 = smul.u32 (%p1069_p12), 400, %s155_s8  ;;  %s1109_s22 = scalar_lea.vmem (%p1069_p12), %s1440_s1, %s712_s19 }
  0x29   : > { %v173_v0 = vld [vmem:[%s1109_s22] sm:$0xff] (%p1069_p12)  ;;  %v175_v1 = vld [vmem:[%s1109_s22 + $0x8] sm:$0xff] (%p1069_p12) }
  0x2a   : > { %v177_v2 = vld [vmem:[%s1109_s22 + $0x20] sm:$0xff]  ;;  %s1114_s11 = scalar_lea.vmem [#allocation5], %s715_s23  ;;  %v179_v3 = vld [vmem:[%s1109_s22 + $0x28] sm:$0xff] }
  0x2b   : > { %174 = vst [vmem:[%s1114_s11] sm:$0xff] %v173_v0  ;;  %v181_v4 = vld [vmem:[%s1109_s22 + $0x40] sm:$0xff]  ;;  %v183_v5 = vld [vmem:[%s1109_s22 + $0x48] sm:$0xff] }
  0x2c   : > { %176 = vst [vmem:[%s1114_s11 + $0x8] sm:$0xff] %v175_v1  ;;  %v185_v6 = vld [vmem:[%s1109_s22 + $0x60] sm:$0xff]  ;;  %v187_v7 = vld [vmem:[%s1109_s22 + $0x68] sm:$0xff] }
  0x2d   : > { %178 = vst [vmem:[%s1114_s11 + $0x10] sm:$0xff] %v177_v2  ;;  %v189_v8 = vld [vmem:[%s1109_s22 + $0x80] sm:$0xff]  ;;  %v191_v9 = vld [vmem:[%s1109_s22 + $0x88] sm:$0xff] }
  0x2e   : > { %180 = vst [vmem:[%s1114_s11 + $0x18] sm:$0xff] %v179_v3  ;;  %v193_v10 = vld [vmem:[%s1109_s22 + $0xa0] sm:$0xff]  ;;  %v195_v11 = vld [vmem:[%s1109_s22 + $0xa8] sm:$0xff] }
  0x2f   : > { %182 = vst [vmem:[%s1114_s11 + $0x20] sm:$0xff] %v181_v4  ;;  %v197_v12 = vld [vmem:[%s1109_s22 + $0xc0] sm:$0xff]  ;;  %v199_v13 = vld [vmem:[%s1109_s22 + $0xc8] sm:$0xff] }
  0x30   : > { %184 = vst [vmem:[%s1114_s11 + $0x28] sm:$0xff] %v183_v5  ;;  %v201_v14 = vld [vmem:[%s1109_s22 + $0xe0] sm:$0xff]  ;;  %v203_v15 = vld [vmem:[%s1109_s22 + $0xe8] sm:$0xff] }
  0x31   : > { %186 = vst [vmem:[%s1114_s11 + $0x30] sm:$0xff] %v185_v6  ;;  %v205_v16 = vld [vmem:[%s1109_s22 + $0x100] sm:$0xff]  ;;  %v207_v17 = vld [vmem:[%s1109_s22 + $0x108] sm:$0xff] }
  0x32   : > { %188 = vst [vmem:[%s1114_s11 + $0x38] sm:$0xff] %v187_v7  ;;  %v209_v18 = vld [vmem:[%s1109_s22 + $0x120] sm:$0xff]  ;;  %v211_v19 = vld [vmem:[%s1109_s22 + $0x128] sm:$0xff] }
  0x33   : > { %190 = vst [vmem:[%s1114_s11 + $0x40] sm:$0xff] %v189_v8  ;;  %v213_v20 = vld [vmem:[%s1109_s22 + $0x140] sm:$0xff]  ;;  %v215_v21 = vld [vmem:[%s1109_s22 + $0x148] sm:$0xff] }
  0x34   : > { %192 = vst [vmem:[%s1114_s11 + $0x48] sm:$0xff] %v191_v9  ;;  %v217_v22 = vld [vmem:[%s1109_s22 + $0x160] sm:$0xff]  ;;  %v219_v23 = vld [vmem:[%s1109_s22 + $0x168] sm:$0xff] }
  0x35   : > { %194 = vst [vmem:[%s1114_s11 + $0x50] sm:$0xff] %v193_v10  ;;  %v221_v24 = vld [vmem:[%s1109_s22 + $0x180] sm:$0xff]  ;;  %v223_v25 = vld [vmem:[%s1109_s22 + $0x188] sm:$0xff] }
  0x36   : > { %196 = vst [vmem:[%s1114_s11 + $0x58] sm:$0xff] %v195_v11  ;;  %v225_v26 = vld [vmem:[%s1109_s22 + $0x1a0] sm:$0xff]  ;;  %v227_v27 = vld [vmem:[%s1109_s22 + $0x1a8] sm:$0xff] }
  0x37   : > { %198 = vst [vmem:[%s1114_s11 + $0x60] sm:$0xff] %v197_v12  ;;  %v229_v28 = vld [vmem:[%s1109_s22 + $0x1c0] sm:$0xff]  ;;  %v231_v29 = vld [vmem:[%s1109_s22 + $0x1c8] sm:$0xff] }
  0x38   : > { %200 = vst [vmem:[%s1114_s11 + $0x68] sm:$0xff] %v199_v13  ;;  %v233_v30 = vld [vmem:[%s1109_s22 + $0x1e0] sm:$0xff]  ;;  %v235_v31 = vld [vmem:[%s1109_s22 + $0x1e8] sm:$0xff] }
  0x39   : > { %202 = vst [vmem:[%s1114_s11 + $0x70] sm:$0xff] %v201_v14  ;;  %v237_v32 = vld [vmem:[%s1109_s22 + $0x200] sm:$0xff]  ;;  %v239_v33 = vld [vmem:[%s1109_s22 + $0x208] sm:$0xff] }
  0x3a   : > { %204 = vst [vmem:[%s1114_s11 + $0x78] sm:$0xff] %v203_v15  ;;  %v241_v34 = vld [vmem:[%s1109_s22 + $0x220] sm:$0xff]  ;;  %v243_v35 = vld [vmem:[%s1109_s22 + $0x228] sm:$0xff] }
  0x3b   : > { %206 = vst [vmem:[%s1114_s11 + $0x80] sm:$0xff] %v205_v16  ;;  %v245_v36 = vld [vmem:[%s1109_s22 + $0x240] sm:$0xff]  ;;  %v247_v37 = vld [vmem:[%s1109_s22 + $0x248] sm:$0xff] }
  0x3c   : > { %208 = vst [vmem:[%s1114_s11 + $0x88] sm:$0xff] %v207_v17  ;;  %v249_v38 = vld [vmem:[%s1109_s22 + $0x260] sm:$0xff]  ;;  %v251_v39 = vld [vmem:[%s1109_s22 + $0x268] sm:$0xff] }
  0x3d   : > { %210 = vst [vmem:[%s1114_s11 + $0x90] sm:$0xff] %v209_v18  ;;  %v253_v40 = vld [vmem:[%s1109_s22 + $0x280] sm:$0xff]  ;;  %v255_v41 = vld [vmem:[%s1109_s22 + $0x288] sm:$0xff] }
  0x3e   : > { %212 = vst [vmem:[%s1114_s11 + $0x98] sm:$0xff] %v211_v19  ;;  %v257_v42 = vld [vmem:[%s1109_s22 + $0x2a0] sm:$0xff]  ;;  %v259_v43 = vld [vmem:[%s1109_s22 + $0x2a8] sm:$0xff] }
  0x3f   : > { %214 = vst [vmem:[%s1114_s11 + $0xa0] sm:$0xff] %v213_v20  ;;  %v261_v44 = vld [vmem:[%s1109_s22 + $0x2c0] sm:$0xff]  ;;  %v263_v45 = vld [vmem:[%s1109_s22 + $0x2c8] sm:$0xff] }
  0x40   : > { %216 = vst [vmem:[%s1114_s11 + $0xa8] sm:$0xff] %v215_v21  ;;  %v265_v46 = vld [vmem:[%s1109_s22 + $0x2e0] sm:$0xff]  ;;  %v267_v47 = vld [vmem:[%s1109_s22 + $0x2e8] sm:$0xff] }
  0x41   : > { %218 = vst [vmem:[%s1114_s11 + $0xb0] sm:$0xff] %v217_v22  ;;  %v269_v48 = vld [vmem:[%s1109_s22 + $0x300] sm:$0xff]  ;;  %v271_v49 = vld [vmem:[%s1109_s22 + $0x308] sm:$0xff] }
  0x42   : > { %220 = vst [vmem:[%s1114_s11 + $0xb8] sm:$0xff] %v219_v23 }
  0x43   : > { %222 = vst [vmem:[%s1114_s11 + $0xc0] sm:$0xff] %v221_v24 }
  0x44   : > { %224 = vst [vmem:[%s1114_s11 + $0xc8] sm:$0xff] %v223_v25 }
  0x45   : > { %226 = vst [vmem:[%s1114_s11 + $0xd0] sm:$0xff] %v225_v26 }
  0x46   : > { %228 = vst [vmem:[%s1114_s11 + $0xd8] sm:$0xff] %v227_v27 }
  0x47   : > { %230 = vst [vmem:[%s1114_s11 + $0xe0] sm:$0xff] %v229_v28 }
  0x48   : > { %232 = vst [vmem:[%s1114_s11 + $0xe8] sm:$0xff] %v231_v29 }
  0x49   : > { %234 = vst [vmem:[%s1114_s11 + $0xf0] sm:$0xff] %v233_v30 }
  0x4a   : > { %236 = vst [vmem:[%s1114_s11 + $0xf8] sm:$0xff] %v235_v31 }
  0x4b   : > { %238 = vst [vmem:[%s1114_s11 + $0x100] sm:$0xff] %v237_v32 }
  0x4c   : > { %240 = vst [vmem:[%s1114_s11 + $0x108] sm:$0xff] %v239_v33 }
  0x4d   : > { %242 = vst [vmem:[%s1114_s11 + $0x110] sm:$0xff] %v241_v34 }
  0x4e   : > { %244 = vst [vmem:[%s1114_s11 + $0x118] sm:$0xff] %v243_v35 }
  0x4f   : > { %246 = vst [vmem:[%s1114_s11 + $0x120] sm:$0xff] %v245_v36 }
  0x50   : > { %248 = vst [vmem:[%s1114_s11 + $0x128] sm:$0xff] %v247_v37 }
  0x51   : > { %250 = vst [vmem:[%s1114_s11 + $0x130] sm:$0xff] %v249_v38 }
  0x52   : > { %252 = vst [vmem:[%s1114_s11 + $0x138] sm:$0xff] %v251_v39 }
  0x53   : > { %254 = vst [vmem:[%s1114_s11 + $0x140] sm:$0xff] %v253_v40 }
  0x54   : > { %256 = vst [vmem:[%s1114_s11 + $0x148] sm:$0xff] %v255_v41 }
  0x55   : > { %258 = vst [vmem:[%s1114_s11 + $0x150] sm:$0xff] %v257_v42 }
  0x56   : > { %260 = vst [vmem:[%s1114_s11 + $0x158] sm:$0xff] %v259_v43 }
  0x57   : > { %262 = vst [vmem:[%s1114_s11 + $0x160] sm:$0xff] %v261_v44 }
  0x58   : > { %264 = vst [vmem:[%s1114_s11 + $0x168] sm:$0xff] %v263_v45 }
  0x59   : > { %266 = vst [vmem:[%s1114_s11 + $0x170] sm:$0xff] %v265_v46 }
  0x5a   : > { %268 = vst [vmem:[%s1114_s11 + $0x178] sm:$0xff] %v267_v47 }
  0x5b   : > { %270 = vst [vmem:[%s1114_s11 + $0x180] sm:$0xff] %v269_v48 }
  0x5c   : > { %272 = vst [vmem:[%s1114_s11 + $0x188] sm:$0xff] %v271_v49 }
  0x5d PF: > { %p707_p1 = scmp.ge.s32.totalorder %s956_s18, 1  ;;  %p277_p3 = scmp.lt.s32.totalorder %s956_s18, 5 }
  0x5f   : > { %p278_p5 = pnand %p707_p1, %p277_p3 }
  0x60   : > { %s1216_s21 = sand.u32 (!%p278_p5), 1, %s932_s12  }
  0x61   : > { %281 = sbr.rel (%p278_p5) target bundleno = 164 (0xa4), region = 47  ;;  %s284_s30 = scalar_lea.sflag (!%p278_p5), [#allocation3], %s1216_s21 }
  0x62   : > { %s716_s25 = smul.u32 (!%p278_p5), 400, %s1216_s21 }
  0x64   : > { %s1222_s3 = scalar_lea.vmem (!%p278_p5), [#allocation2], %s716_s25 }
  0x66   : > { %911 = dma.done.wait (%p1059_p7), %s284_s30, 6400  }
  0x67   : > { %913 = vsyncadd (%p1059_p7), %s284_s30, 4294960896  ;;  %s294_s4 = sand.u32 1, %s920_s9   ;;  %v323_v50 = vld [vmem:[%s1222_s3] sm:$0xff]  ;;  %v324_v52 = vld [vmem:[%s1222_s3 + $0x8] sm:$0xff]  ;;  %s1246_s9 = scalar_lea.vmem [#allocation6], %s716_s25 }
  0x68   : > { %s717_s5 = smul.u32 400, %s294_s4  ;;  %v373_v53 = vmul.f32 22.627417, %v323_v50  ;;  %v374_v54 = vmul.f32 22.627417, %v324_v52  ;;  %v325_v56 = vld [vmem:[%s1222_s3 + $0x10] sm:$0xff] }
  0x69   : > { %v375_v57 = vmul.f32 22.627417, %v325_v56  ;;  %v326_v59 = vld [vmem:[%s1222_s3 + $0x18] sm:$0xff]  ;;  %v327_v0 = vld [vmem:[%s1222_s3 + $0x20] sm:$0xff]  ;;  %v328_v2 = vld [vmem:[%s1222_s3 + $0x28] sm:$0xff]  ;;  %s718_s27 = smul.u32 100, %s940_s14 }
  0x6a   : > { %s1230_s6 = scalar_lea.vmem [#allocation5], %s717_s5  ;;  %v376_v63 = vmul.f32 22.627417, %v326_v59  ;;  %v377_v4 = vmul.f32 22.627417, %v327_v0  ;;  %v329_v7 = vld [vmem:[%s1222_s3 + $0x30] sm:$0xff] }
  0x6b   : > { %v423_v51 = vld [vmem:[%s1230_s6] sm:$0xff]  ;;  %v424_v55 = vld [vmem:[%s1230_s6 + $0x8] sm:$0xff]  ;;  %v425_v58 = vld [vmem:[%s1230_s6 + $0x10] sm:$0xff]  ;;  %v378_v5 = vmul.f32 22.627417, %v328_v2  ;;  %s708_s7 = sshll.u32 %s944_s15, 1 }
  0x6c   : > { %v426_v60 = vld [vmem:[%s1230_s6 + $0x18] sm:$0xff]  ;;  %v473_v61 = vadd.f32 %v423_v51, %v373_v53  ;;  %v474_v62 = vadd.f32 %v424_v55, %v374_v54  ;;  %v427_v1 = vld [vmem:[%s1230_s6 + $0x20] sm:$0xff]  ;;  %v475_v3 = vadd.f32 %v425_v58, %v375_v57  ;;  %v428_v6 = vld [vmem:[%s1230_s6 + $0x28] sm:$0xff]  ;;  %v379_v9 = vmul.f32 22.627417, %v329_v7  ;;  %s1356_s14 = sadd.s32 %s718_s27, %s708_s7  ;;  %s588_s8 = sshll.u32 %s1246_s9, 4  ;;  %s589_s8 = int_to_ptr.vmem [resolvable:$true] %s588_s8 }
  0x6d   : > { %v476_v8 = vadd.f32 %v426_v60, %v376_v63  ;;  %v429_v10 = vld [vmem:[%s1230_s6 + $0x30] sm:$0xff]  ;;  %v330_v11 = vld [vmem:[%s1222_s3 + $0x38] sm:$0xff]  ;;  %v477_v13 = vadd.f32 %v427_v1, %v377_v4  ;;  %v478_v14 = vadd.f32 %v428_v6, %v378_v5  ;;  %v331_v16 = vld [vmem:[%s1222_s3 + $0x40] sm:$0xff]  ;;  %s709_s15 = sshll.u32 %s1356_s14, 3  ;;  %s574_s24 = scalar_lea.sflag [#allocation4], %s1216_s21 }
  0x6e   : > { %523 = vst [vmem:[%s1246_s9] sm:$0xff] %v473_v61  ;;  %v430_v12 = vld [vmem:[%s1230_s6 + $0x38] sm:$0xff]  ;;  %v380_v15 = vmul.f32 22.627417, %v330_v11  ;;  %v431_v17 = vld [vmem:[%s1230_s6 + $0x40] sm:$0xff]  ;;  %v332_v18 = vld [vmem:[%s1222_s3 + $0x48] sm:$0xff]  ;;  %v479_v19 = vadd.f32 %v429_v10, %v379_v9  ;;  %s587_s29 = scalar_lea.hbm %s1441_s2, %s709_s15  ;;  %s862_s30 = scalar_lea.hbm %s1441_s2, 1600 }
  0x6f   : > { %524 = vst [vmem:[%s1246_s9 + $0x8] sm:$0xff] %v474_v62  ;;  %v381_v20 = vmul.f32 22.627417, %v331_v16  ;;  %v382_v21 = vmul.f32 22.627417, %v332_v18  ;;  %v432_v22 = vld [vmem:[%s1230_s6 + $0x48] sm:$0xff] }
  0x70   : > { %525 = vst [vmem:[%s1246_s9 + $0x10] sm:$0xff] %v475_v3  ;;  %v480_v23 = vadd.f32 %v430_v12, %v380_v15  ;;  %v333_v24 = vld [vmem:[%s1222_s3 + $0x50] sm:$0xff]  ;;  %v334_v26 = vld [vmem:[%s1222_s3 + $0x58] sm:$0xff]  ;;  %v335_v32 = vld [vmem:[%s1222_s3 + $0x60] sm:$0xff]  ;;  %s590_s23 = sshll.u32 %s587_s29, 4  ;;  %s591_s23 = int_to_ptr.hbm [resolvable:$true] %s590_s23 }
  0x71   : > { %526 = vst [vmem:[%s1246_s9 + $0x18] sm:$0xff] %v476_v8  ;;  %v433_v25 = vld [vmem:[%s1230_s6 + $0x50] sm:$0xff]  ;;  %v481_v27 = vadd.f32 %v431_v17, %v381_v20  ;;  %v383_v28 = vmul.f32 22.627417, %v333_v24  ;;  %v384_v29 = vmul.f32 22.627417, %v334_v26  ;;  %v482_v31 = vadd.f32 %v432_v22, %v382_v21 }
  0x72   : > { %527 = vst [vmem:[%s1246_s9 + $0x20] sm:$0xff] %v477_v13  ;;  %v434_v30 = vld [vmem:[%s1230_s6 + $0x58] sm:$0xff]  ;;  %v435_v33 = vld [vmem:[%s1230_s6 + $0x60] sm:$0xff]  ;;  %v336_v34 = vld [vmem:[%s1222_s3 + $0x68] sm:$0xff]  ;;  %v385_v36 = vmul.f32 22.627417, %v335_v32 }
  0x73   : > { %528 = vst [vmem:[%s1246_s9 + $0x28] sm:$0xff] %v478_v14  ;;  %v483_v35 = vadd.f32 %v433_v25, %v383_v28  ;;  %v386_v37 = vmul.f32 22.627417, %v336_v34  ;;  %v436_v38 = vld [vmem:[%s1230_s6 + $0x68] sm:$0xff]  ;;  %v484_v39 = vadd.f32 %v434_v30, %v384_v29  ;;  %v337_v40 = vld [vmem:[%s1222_s3 + $0x70] sm:$0xff]  ;;  %v338_v42 = vld [vmem:[%s1222_s3 + $0x78] sm:$0xff] }
  0x74   : > { %529 = vst [vmem:[%s1246_s9 + $0x30] sm:$0xff] %v479_v19  ;;  %v437_v41 = vld [vmem:[%s1230_s6 + $0x70] sm:$0xff]  ;;  %v485_v43 = vadd.f32 %v435_v33, %v385_v36  ;;  %v387_v44 = vmul.f32 22.627417, %v337_v40  ;;  %v388_v45 = vmul.f32 22.627417, %v338_v42 }
  0x75   : > { %530 = vst [vmem:[%s1246_s9 + $0x38] sm:$0xff] %v480_v23  ;;  %v438_v46 = vld [vmem:[%s1230_s6 + $0x78] sm:$0xff]  ;;  %v486_v47 = vadd.f32 %v436_v38, %v386_v37  ;;  %v339_v48 = vld [vmem:[%s1222_s3 + $0x80] sm:$0xff]  ;;  %v340_v50 = vld [vmem:[%s1222_s3 + $0x88] sm:$0xff]  ;;  %s856_s26 = sshra.s32 %s591_s23, 4  ;;  %s857_s26 = int_to_ptr.hbm [resolvable:$true] %s856_s26 }
  0x76   : > { %531 = vst [vmem:[%s1246_s9 + $0x40] sm:$0xff] %v481_v27  ;;  %v439_v49 = vld [vmem:[%s1230_s6 + $0x80] sm:$0xff]  ;;  %v487_v51 = vadd.f32 %v437_v41, %v387_v44  ;;  %v389_v52 = vmul.f32 22.627417, %v339_v48  ;;  %v390_v53 = vmul.f32 22.627417, %v340_v50  ;;  %v488_v55 = vadd.f32 %v438_v46, %v388_v45  ;;  %p863_p9 = scmp.lt.s32.totalorder %s857_s26, %s1441_s2 }
  0x77   : > { %532 = vst [vmem:[%s1246_s9 + $0x48] sm:$0xff] %v482_v31  ;;  %v440_v54 = vld [vmem:[%s1230_s6 + $0x88] sm:$0xff]  ;;  %v341_v56 = vld [vmem:[%s1222_s3 + $0x90] sm:$0xff]  ;;  %v342_v58 = vld [vmem:[%s1222_s3 + $0x98] sm:$0xff]  ;;  %s858_s22 = scalar_lea.hbm %s857_s26, 400 }
  0x78   : > { %533 = vst [vmem:[%s1246_s9 + $0x50] sm:$0xff] %v483_v35  ;;  %v441_v57 = vld [vmem:[%s1230_s6 + $0x90] sm:$0xff]  ;;  %v489_v59 = vadd.f32 %v439_v49, %v389_v52  ;;  %v391_v60 = vmul.f32 22.627417, %v341_v56  ;;  %v392_v61 = vmul.f32 22.627417, %v342_v58  ;;  %v490_v63 = vadd.f32 %v440_v54, %v390_v53  ;;  %p859_p6 = scmp.ne.s32.totalorder %s857_s26, %s858_s22  ;;  %p864_p10 = scmp.lt.s32.totalorder %s862_s30, %s858_s22 }
  0x79   : > { %534 = vst [vmem:[%s1246_s9 + $0x58] sm:$0xff] %v484_v39  ;;  %v442_v62 = vld [vmem:[%s1230_s6 + $0x98] sm:$0xff]  ;;  %v343_v0 = vld [vmem:[%s1222_s3 + $0xa0] sm:$0xff]  ;;  %v344_v2 = vld [vmem:[%s1222_s3 + $0xa8] sm:$0xff] }
  0x7a   : > { %535 = vst [vmem:[%s1246_s9 + $0x60] sm:$0xff] %v485_v43  ;;  %v443_v1 = vld [vmem:[%s1230_s6 + $0xa0] sm:$0xff]  ;;  %v491_v3 = vadd.f32 %v441_v57, %v391_v60  ;;  %v393_v4 = vmul.f32 22.627417, %v343_v0  ;;  %v394_v5 = vmul.f32 22.627417, %v344_v2  ;;  %v492_v7 = vadd.f32 %v442_v62, %v392_v61  ;;  %p860_p7 = pnand %p859_p6, %p1082_p13  ;;  %p865_p11 = por %p864_p10, %p863_p9 }
  0x7b   : > { %536 = vst [vmem:[%s1246_s9 + $0x68] sm:$0xff] %v486_v47  ;;  %v444_v6 = vld [vmem:[%s1230_s6 + $0xa8] sm:$0xff]  ;;  %v345_v8 = vld [vmem:[%s1222_s3 + $0xb0] sm:$0xff]  ;;  %v346_v10 = vld [vmem:[%s1222_s3 + $0xb8] sm:$0xff] }
  0x7c   : > { %537 = vst [vmem:[%s1246_s9 + $0x70] sm:$0xff] %v487_v51  ;;  %v445_v9 = vld [vmem:[%s1230_s6 + $0xb0] sm:$0xff]  ;;  %v493_v11 = vadd.f32 %v443_v1, %v393_v4  ;;  %v395_v12 = vmul.f32 22.627417, %v345_v8  ;;  %v396_v13 = vmul.f32 22.627417, %v346_v10  ;;  %v494_v15 = vadd.f32 %v444_v6, %v394_v5  ;;  %p861_p8 = pneg %p860_p7 }
  0x7d   : > { %538 = vst [vmem:[%s1246_s9 + $0x78] sm:$0xff] %v488_v55  ;;  %v446_v14 = vld [vmem:[%s1230_s6 + $0xb8] sm:$0xff]  ;;  %v347_v16 = vld [vmem:[%s1222_s3 + $0xc0] sm:$0xff]  ;;  %v348_v18 = vld [vmem:[%s1222_s3 + $0xc8] sm:$0xff] }
  0x7e   : > { %539 = vst [vmem:[%s1246_s9 + $0x80] sm:$0xff] %v489_v59  ;;  %v447_v17 = vld [vmem:[%s1230_s6 + $0xc0] sm:$0xff]  ;;  %v495_v19 = vadd.f32 %v445_v9, %v395_v12  ;;  %v397_v20 = vmul.f32 22.627417, %v347_v16  ;;  %v398_v21 = vmul.f32 22.627417, %v348_v18  ;;  %v496_v23 = vadd.f32 %v446_v14, %v396_v13  ;;  %p866_p12 = pnand %p865_p11, %p861_p8 }
  0x7f   : > { %540 = vst [vmem:[%s1246_s9 + $0x88] sm:$0xff] %v490_v63  ;;  %v448_v22 = vld [vmem:[%s1230_s6 + $0xc8] sm:$0xff]  ;;  %v349_v24 = vld [vmem:[%s1222_s3 + $0xd0] sm:$0xff]  ;;  %v350_v26 = vld [vmem:[%s1222_s3 + $0xd8] sm:$0xff] }
  0x80   : > { %541 = vst [vmem:[%s1246_s9 + $0x90] sm:$0xff] %v491_v3  ;;  %v449_v25 = vld [vmem:[%s1230_s6 + $0xd0] sm:$0xff]  ;;  %v497_v27 = vadd.f32 %v447_v17, %v397_v20  ;;  %v399_v28 = vmul.f32 22.627417, %v349_v24  ;;  %v400_v29 = vmul.f32 22.627417, %v350_v26  ;;  %v498_v31 = vadd.f32 %v448_v22, %v398_v21 }
  0x81   : > { %542 = vst [vmem:[%s1246_s9 + $0x98] sm:$0xff] %v492_v7  ;;  %v450_v30 = vld [vmem:[%s1230_s6 + $0xd8] sm:$0xff]  ;;  %v351_v32 = vld [vmem:[%s1222_s3 + $0xe0] sm:$0xff]  ;;  %v352_v34 = vld [vmem:[%s1222_s3 + $0xe8] sm:$0xff] }
  0x82   : > { %543 = vst [vmem:[%s1246_s9 + $0xa0] sm:$0xff] %v493_v11  ;;  %v451_v33 = vld [vmem:[%s1230_s6 + $0xe0] sm:$0xff]  ;;  %v499_v35 = vadd.f32 %v449_v25, %v399_v28  ;;  %v401_v36 = vmul.f32 22.627417, %v351_v32  ;;  %v402_v37 = vmul.f32 22.627417, %v352_v34  ;;  %v500_v39 = vadd.f32 %v450_v30, %v400_v29 }
  0x83   : > { %544 = vst [vmem:[%s1246_s9 + $0xa8] sm:$0xff] %v494_v15  ;;  %v452_v38 = vld [vmem:[%s1230_s6 + $0xe8] sm:$0xff]  ;;  %v353_v40 = vld [vmem:[%s1222_s3 + $0xf0] sm:$0xff]  ;;  %v354_v42 = vld [vmem:[%s1222_s3 + $0xf8] sm:$0xff] }
  0x84   : > { %545 = vst [vmem:[%s1246_s9 + $0xb0] sm:$0xff] %v495_v19  ;;  %v453_v41 = vld [vmem:[%s1230_s6 + $0xf0] sm:$0xff]  ;;  %v501_v43 = vadd.f32 %v451_v33, %v401_v36  ;;  %v403_v44 = vmul.f32 22.627417, %v353_v40  ;;  %v404_v45 = vmul.f32 22.627417, %v354_v42  ;;  %v502_v47 = vadd.f32 %v452_v38, %v402_v37 }
  0x85   : > { %546 = vst [vmem:[%s1246_s9 + $0xb8] sm:$0xff] %v496_v23  ;;  %v454_v46 = vld [vmem:[%s1230_s6 + $0xf8] sm:$0xff]  ;;  %v355_v48 = vld [vmem:[%s1222_s3 + $0x100] sm:$0xff]  ;;  %v356_v50 = vld [vmem:[%s1222_s3 + $0x108] sm:$0xff] }
  0x86   : > { %547 = vst [vmem:[%s1246_s9 + $0xc0] sm:$0xff] %v497_v27  ;;  %v455_v49 = vld [vmem:[%s1230_s6 + $0x100] sm:$0xff]  ;;  %v503_v51 = vadd.f32 %v453_v41, %v403_v44  ;;  %v405_v52 = vmul.f32 22.627417, %v355_v48  ;;  %v406_v53 = vmul.f32 22.627417, %v356_v50  ;;  %v504_v55 = vadd.f32 %v454_v46, %v404_v45 }
  0x87   : > { %548 = vst [vmem:[%s1246_s9 + $0xc8] sm:$0xff] %v498_v31  ;;  %v456_v54 = vld [vmem:[%s1230_s6 + $0x108] sm:$0xff]  ;;  %v357_v56 = vld [vmem:[%s1222_s3 + $0x110] sm:$0xff]  ;;  %v358_v58 = vld [vmem:[%s1222_s3 + $0x118] sm:$0xff] }
  0x88   : > { %549 = vst [vmem:[%s1246_s9 + $0xd0] sm:$0xff] %v499_v35  ;;  %v457_v57 = vld [vmem:[%s1230_s6 + $0x110] sm:$0xff]  ;;  %v505_v59 = vadd.f32 %v455_v49, %v405_v52  ;;  %v407_v60 = vmul.f32 22.627417, %v357_v56  ;;  %v408_v61 = vmul.f32 22.627417, %v358_v58  ;;  %v506_v63 = vadd.f32 %v456_v54, %v406_v53 }
  0x89   : > { %550 = vst [vmem:[%s1246_s9 + $0xd8] sm:$0xff] %v500_v39  ;;  %v458_v62 = vld [vmem:[%s1230_s6 + $0x118] sm:$0xff]  ;;  %v359_v0 = vld [vmem:[%s1222_s3 + $0x120] sm:$0xff]  ;;  %v360_v2 = vld [vmem:[%s1222_s3 + $0x128] sm:$0xff] }
  0x8a   : > { %551 = vst [vmem:[%s1246_s9 + $0xe0] sm:$0xff] %v501_v43  ;;  %v459_v1 = vld [vmem:[%s1230_s6 + $0x120] sm:$0xff]  ;;  %v507_v3 = vadd.f32 %v457_v57, %v407_v60  ;;  %v409_v4 = vmul.f32 22.627417, %v359_v0  ;;  %v410_v5 = vmul.f32 22.627417, %v360_v2  ;;  %v508_v7 = vadd.f32 %v458_v62, %v408_v61 }
  0x8b   : > { %552 = vst [vmem:[%s1246_s9 + $0xe8] sm:$0xff] %v502_v47  ;;  %v460_v6 = vld [vmem:[%s1230_s6 + $0x128] sm:$0xff]  ;;  %v361_v8 = vld [vmem:[%s1222_s3 + $0x130] sm:$0xff]  ;;  %v362_v10 = vld [vmem:[%s1222_s3 + $0x138] sm:$0xff] }
  0x8c   : > { %553 = vst [vmem:[%s1246_s9 + $0xf0] sm:$0xff] %v503_v51  ;;  %v461_v9 = vld [vmem:[%s1230_s6 + $0x130] sm:$0xff]  ;;  %v509_v11 = vadd.f32 %v459_v1, %v409_v4  ;;  %v411_v12 = vmul.f32 22.627417, %v361_v8  ;;  %v412_v13 = vmul.f32 22.627417, %v362_v10  ;;  %v510_v15 = vadd.f32 %v460_v6, %v410_v5 }
  0x8d   : > { %554 = vst [vmem:[%s1246_s9 + $0xf8] sm:$0xff] %v504_v55  ;;  %v462_v14 = vld [vmem:[%s1230_s6 + $0x138] sm:$0xff]  ;;  %v363_v16 = vld [vmem:[%s1222_s3 + $0x140] sm:$0xff]  ;;  %v364_v18 = vld [vmem:[%s1222_s3 + $0x148] sm:$0xff] }
  0x8e   : > { %555 = vst [vmem:[%s1246_s9 + $0x100] sm:$0xff] %v505_v59  ;;  %v463_v17 = vld [vmem:[%s1230_s6 + $0x140] sm:$0xff]  ;;  %v511_v19 = vadd.f32 %v461_v9, %v411_v12  ;;  %v413_v20 = vmul.f32 22.627417, %v363_v16  ;;  %v414_v21 = vmul.f32 22.627417, %v364_v18  ;;  %v512_v23 = vadd.f32 %v462_v14, %v412_v13 }
  0x8f   : > { %556 = vst [vmem:[%s1246_s9 + $0x108] sm:$0xff] %v506_v63  ;;  %v464_v22 = vld [vmem:[%s1230_s6 + $0x148] sm:$0xff]  ;;  %v365_v24 = vld [vmem:[%s1222_s3 + $0x150] sm:$0xff]  ;;  %v366_v26 = vld [vmem:[%s1222_s3 + $0x158] sm:$0xff] }
  0x90   : > { %557 = vst [vmem:[%s1246_s9 + $0x110] sm:$0xff] %v507_v3  ;;  %v465_v25 = vld [vmem:[%s1230_s6 + $0x150] sm:$0xff]  ;;  %v513_v27 = vadd.f32 %v463_v17, %v413_v20  ;;  %v415_v28 = vmul.f32 22.627417, %v365_v24  ;;  %v416_v29 = vmul.f32 22.627417, %v366_v26  ;;  %v514_v31 = vadd.f32 %v464_v22, %v414_v21 }
  0x91   : > { %558 = vst [vmem:[%s1246_s9 + $0x118] sm:$0xff] %v508_v7  ;;  %v466_v30 = vld [vmem:[%s1230_s6 + $0x158] sm:$0xff]  ;;  %v367_v32 = vld [vmem:[%s1222_s3 + $0x160] sm:$0xff]  ;;  %v368_v34 = vld [vmem:[%s1222_s3 + $0x168] sm:$0xff] }
  0x92   : > { %559 = vst [vmem:[%s1246_s9 + $0x120] sm:$0xff] %v509_v11  ;;  %v467_v33 = vld [vmem:[%s1230_s6 + $0x160] sm:$0xff]  ;;  %v515_v35 = vadd.f32 %v465_v25, %v415_v28  ;;  %v417_v36 = vmul.f32 22.627417, %v367_v32  ;;  %v418_v37 = vmul.f32 22.627417, %v368_v34  ;;  %v516_v39 = vadd.f32 %v466_v30, %v416_v29 }
  0x93   : > { %560 = vst [vmem:[%s1246_s9 + $0x128] sm:$0xff] %v510_v15  ;;  %v468_v38 = vld [vmem:[%s1230_s6 + $0x168] sm:$0xff]  ;;  %v369_v40 = vld [vmem:[%s1222_s3 + $0x170] sm:$0xff]  ;;  %v370_v42 = vld [vmem:[%s1222_s3 + $0x178] sm:$0xff] }
  0x94   : > { %561 = vst [vmem:[%s1246_s9 + $0x130] sm:$0xff] %v511_v19  ;;  %v469_v41 = vld [vmem:[%s1230_s6 + $0x170] sm:$0xff]  ;;  %v517_v43 = vadd.f32 %v467_v33, %v417_v36  ;;  %v419_v44 = vmul.f32 22.627417, %v369_v40  ;;  %v420_v45 = vmul.f32 22.627417, %v370_v42  ;;  %v518_v47 = vadd.f32 %v468_v38, %v418_v37 }
  0x95   : > { %562 = vst [vmem:[%s1246_s9 + $0x138] sm:$0xff] %v512_v23  ;;  %v470_v46 = vld [vmem:[%s1230_s6 + $0x178] sm:$0xff]  ;;  %v371_v48 = vld [vmem:[%s1222_s3 + $0x180] sm:$0xff]  ;;  %v372_v50 = vld [vmem:[%s1222_s3 + $0x188] sm:$0xff] }
  0x96   : > { %563 = vst [vmem:[%s1246_s9 + $0x140] sm:$0xff] %v513_v27  ;;  %v471_v49 = vld [vmem:[%s1230_s6 + $0x180] sm:$0xff]  ;;  %v519_v51 = vadd.f32 %v469_v41, %v419_v44  ;;  %v421_v52 = vmul.f32 22.627417, %v371_v48  ;;  %v422_v53 = vmul.f32 22.627417, %v372_v50  ;;  %v520_v55 = vadd.f32 %v470_v46, %v420_v45 }
  0x97   : > { %564 = vst [vmem:[%s1246_s9 + $0x148] sm:$0xff] %v514_v31  ;;  %v472_v54 = vld [vmem:[%s1230_s6 + $0x188] sm:$0xff] }
  0x98   : > { %565 = vst [vmem:[%s1246_s9 + $0x150] sm:$0xff] %v515_v35  ;;  %v521_v56 = vadd.f32 %v471_v49, %v421_v52  ;;  %v522_v57 = vadd.f32 %v472_v54, %v422_v53 }
  0x99   : > { %566 = vst [vmem:[%s1246_s9 + $0x158] sm:$0xff] %v516_v39 }
  0x9a   : > { %567 = vst [vmem:[%s1246_s9 + $0x160] sm:$0xff] %v517_v43 }
  0x9b   : > { %568 = vst [vmem:[%s1246_s9 + $0x168] sm:$0xff] %v518_v47 }
  0x9c   : > { %569 = vst [vmem:[%s1246_s9 + $0x170] sm:$0xff] %v519_v51 }
  0x9d   : > { %570 = vst [vmem:[%s1246_s9 + $0x178] sm:$0xff] %v520_v55 }
  0x9e   : > { %571 = vst [vmem:[%s1246_s9 + $0x180] sm:$0xff] %v521_v56 }
  0x9f   : > { %572 = vst [vmem:[%s1246_s9 + $0x188] sm:$0xff] %v522_v57 }
  0xa0   : > { %869 = shalt.err (!%p866_p12)
}
  0xa1   : > { %s961_s21 = smov 256   ;;  %s962_s5 = smov 512  }
  0xa2   : > { %s963_s6 = smov 16  }
  0xa3   : > { %721 = dma.vmem_to_hbm [thread:$0]  (%p1082_p13), %s589_s8, 6400, %s591_s23, %s574_s24, %s961_s21, %s962_s5, %s963_s6  }
  0xa4 PF: > { %s1461_s9 = sld [smem:[#allocation9_spill]]  ;;  %p727_p0 = scmp.ge.s32.totalorder %s956_s18, 2 }
  0xa6   : > { %p724_p2 = pnand %p727_p0, %p1089_p4 }
  0xa8   : > { %p725_p1 = pneg %p724_p2 }
  0xaa   : > { %s605_s7 = sand.u32 1, %s1461_s9  }
  0xab   : > { %s606_s14 = scalar_lea.sflag [#allocation4], %s605_s7 }
  0xac   : > { %915 = dma.done.wait (%p725_p1), %s606_s14, 6400  }
  0xad   : > { %917 = vsyncadd (%p725_p1), %s606_s14, 4294960896  ;;  %s18_s18 = sadd.s32 1, %s956_s18   ;;  %s1463_s15 = sld [smem:[#allocation12_spill]] }
  0xae   : > { %p15_p3 = scmp.ge.s32.totalorder %s18_s18, 6   ;;  %s1464_s28 = sld [smem:[#allocation13_spill]] }
  0xaf   : > { %s1465_s20 = sld [smem:[#allocation10_spill]]  ;;  %s1467_s9 = smov %s924_s10 }
  0xb0   : > { %s1466_s29 = sld [smem:[#allocation11_spill]]  ;;  %s1469_s11 = smov %s932_s12 }
  0xb1   : > { %s1470_s12 = smov %s936_s13  ;;  %s1472_s14 = smov %s948_s16 }
  0xb2   :  { %17 = sbr.rel (!%p15_p3) target bundleno = 8 (0x8), region = 104 }
  0xb3   : > { %s1468_s10 = smov %s1463_s15  ;;  %s1473_s15 = smov %s952_s17 }
  0xb4   : > { %s1471_s13 = smov %s1464_s28 }
  0xb5   : > { %s1474_s16 = smov %s1465_s20 }
  0xb6   : > { %s1475_s17 = smov %s1466_s29 }
  0xb7   :  { %612 = vsyncpa [#allocation3], 1 }
  0xb8   :  { %614 = vsyncpa [#allocation3 + $0x1], 1 }
  0xb9   :  { %615 = vsyncpa [#allocation4], 1 }
  0xba   :  { %617 = vsyncpa [#allocation4 + $0x1], 1 }

</bundles_post_ra>
